<compile_context>
chip_gen: v7x
topology: tpu7x:2x2x1
jax: 0.10.0
libtpu: 0.0.40
codegen_flags: <defaults>
</compile_context>

<pallas_src>
import jax
import jax.numpy as jnp
from jax.experimental import pallas as pl
from jax.experimental.pallas import tpu as pltpu


def fnn_kernel(x_ref, w1_ref, wm_ref, w3_ref, bias_ref, states_ref, out_ref):
    # ---- Layer H1: Linear(D_in, 8) + ReLU  (MXU, bf16 inputs / f32 acc) ----
    x = x_ref[...].astype(jnp.bfloat16)                   # in-kernel cast: no extra HBM pass
    h1 = jnp.dot(x, w1_ref[...], preferred_element_type=jnp.float32)
    h1 = jnp.maximum(h1 + bias_ref[0:1, 0:8], 0.0)        # (tb, 8) f32

    # ---- Fused layer-H2 / active-state matmul (MXU) ----
    # wm = [ I8 | W2 | 0 ] (8,16), bias row 1 = [ 0 | b2 | 0 ], therefore:
    #   pre[:, 0:8]  = h1                 (identity pass-through)
    #   pre[:, 8:10] = h1 @ W2 + b2       (pre-ReLU h2; ReLU preserves sign)
    #   pre[:,10:16] = 0                  (padding lanes)
    pre = (jnp.dot(h1, wm_ref[...], preferred_element_type=jnp.float32)
           + bias_ref[1:2, 0:16])                         # (tb, 16) f32

    # Both active-state masks in ONE lane-dense int8 store:
    #   lanes 0-7 = (h1 > 0), lanes 8-9 = (h2 > 0), lanes 10-15 = 0.
    states_ref[...] = (pre > 0.0).astype(jnp.int8)

    # ---- Layer H2 activations + output layer: Linear(2, D_out)  (MXU) ----
    h2p = jnp.maximum(pre[:, 8:16], 0.0)                  # (tb, 8): lanes 2-7 are exactly 0
    d_out = out_ref.shape[1]
    out = (jnp.dot(h2p, w3_ref[...], preferred_element_type=jnp.float32)
           + bias_ref[2:3, 0:d_out])
    out_ref[...] = out.astype(out_ref.dtype)


def three_layer_fnn(x, params, *, block_b=4096):
    """params: dict with PyTorch-convention Linear weights/biases.

    Returns ({'h1.state': (B,8) int8, 'h2.state': (B,2) int8}, out (B,D_out) f32).
    """
    B, D_in = x.shape
    D_out = params["fc.weight"].shape[0]
    assert D_out <= 128, "bias packing assumes D_out <= 128"

    # PyTorch Linear weights are (out, in) -> transpose to (in, out).
    w1 = params["H1.weight"].T.astype(jnp.bfloat16)                  # (D_in, 8)
    w2 = params["H2.weight"].T.astype(jnp.float32)                   # (8, 2)
    # Fused mask/layer-2 matrix [I8 | W2 | 0] and zero-row-padded fc weight.
    wm = jnp.zeros((8, 16), jnp.float32)
    wm = wm.at[:, :8].set(jnp.eye(8, dtype=jnp.float32))
    wm = wm.at[:, 8:10].set(w2)
    w3p = jnp.zeros((8, D_out), jnp.float32)
    w3p = w3p.at[:2, :].set(params["fc.weight"].T.astype(jnp.float32))

    # One lane-aligned bias block: row0=b1, row1=[0 | b2 | 0], row2=b3.
    bias_pack = jnp.zeros((3, 128), jnp.float32)
    bias_pack = bias_pack.at[0, :8].set(params["H1.bias"].astype(jnp.float32))
    bias_pack = bias_pack.at[1, 8:10].set(params["H2.bias"].astype(jnp.float32))
    bias_pack = bias_pack.at[2, :D_out].set(params["fc.bias"].astype(jnp.float32))

    # ---- batch tile selection ----
    # The kernel is HBM-bound at ~O(100) bytes/row, so big tiles (multi-MB per
    # grid step) amortize the per-step pipeline overhead.  Clamp so the grid
    # keeps >= 2 tiles (v7x two-TC sharding of the "parallel" axis), keep the
    # double-buffered x tile well under the default scoped-VMEM limit, and make
    # the tile a multiple of 32 (covers the int8 (32,128) native tiling).  The
    # ragged last tile is handled by Pallas' boundary masking — no wrapper pad.
    desired = min(block_b, B)
    max_rows = max(32, (8 * 1024 * 1024) // max(1, D_in * x.dtype.itemsize))
    desired = min(desired, max_rows)
    if B >= 64:
        desired = min(desired, -(-B // 2))                # ceil(B/2): >= 2 tiles
    if desired >= B:
        tb = B                                            # single full-array tile
    else:
        tb = max(32, (desired // 32) * 32)
        if tb >= B:
            tb = B
    nb = pl.cdiv(B, tb)

    flops = 2 * B * (D_in * 8 + 8 * 16 + 8 * D_out)
    bytes_accessed = (B * D_in * x.dtype.itemsize                     # x (original dtype, single pass)
                      + D_in * 8 * 2 + 8 * 16 * 4 + 8 * D_out * 4 + 3 * 128 * 4
                      + B * 16                                        # merged int8 masks
                      + B * D_out * 4)                                # out (f32)

    states_pack, out = pl.pallas_call(
        fnn_kernel,
        out_shape=(
            jax.ShapeDtypeStruct((B, 16), jnp.int8),
            jax.ShapeDtypeStruct((B, D_out), jnp.float32),
        ),
        grid_spec=pltpu.PrefetchScalarGridSpec(
            num_scalar_prefetch=0,
            grid=(nb,),
            in_specs=[
                pl.BlockSpec((tb, D_in), lambda i: (i, 0)),   # x: tiled on batch
                pl.BlockSpec((D_in, 8), lambda i: (0, 0)),    # w1: VMEM-resident
                pl.BlockSpec((8, 16), lambda i: (0, 0)),      # [I8|W2|0]: resident
                pl.BlockSpec((8, D_out), lambda i: (0, 0)),   # padded fc: resident
                pl.BlockSpec((3, 128), lambda i: (0, 0)),     # biases: resident
            ],
            out_specs=(
                pl.BlockSpec((tb, 16), lambda i: (i, 0)),     # merged int8 masks
                pl.BlockSpec((tb, D_out), lambda i: (i, 0)),  # out
            ),
        ),
        compiler_params=pltpu.CompilerParams(
            # Independent batch tiles -> v7x can split them across its 2 TCs.
            dimension_semantics=("parallel",),
        ),
        cost_estimate=pl.CostEstimate(
            flops=flops, bytes_accessed=bytes_accessed, transcendentals=0),
    )(x, w1, wm, w3p, bias_pack)

    # Split the merged mask block.  (PyTorch's active_state returns numpy int;
    # int8 is kept deliberately for 4-8x less HBM writeback — cast if needed.)
    states = {"h1.state": states_pack[:, :8], "h2.state": states_pack[:, 8:10]}
    return states, out


def init_params(key, D_in, D_out):
    """Deterministic init mimicking nn.Linear shapes (PyTorch convention)."""
    ks = jax.random.split(key, 6)

    def uniform(k, shape, fan_in):
        bound = 1.0 / jnp.sqrt(fan_in)
        return jax.random.uniform(k, shape, jnp.float32, -bound, bound)

    return {
        "H1.weight": uniform(ks[0], (8, D_in), D_in),
        "H1.bias":   uniform(ks[1], (8,), D_in),
        "H2.weight": uniform(ks[2], (2, 8), 8),
        "H2.bias":   uniform(ks[3], (2,), 8),
        "fc.weight": uniform(ks[4], (D_out, 2), 2),
        "fc.bias":   uniform(ks[5], (D_out,), 2),
    }


if __name__ == "__main__":
    key = jax.random.PRNGKey(0)
    B, D_in, D_out = 200, 32, 10     # ragged B: three 96-row tiles, last partial

    k_x, k_p = jax.random.split(key)
    x = jax.random.normal(k_x, (B, D_in), jnp.float32)
    params = init_params(k_p, D_in, D_out)

    states, out = three_layer_fnn(x, params)
    jax.block_until_ready((states, out))

    # Reference in plain JAX: layer 1 matches the kernel's bf16 MXU numerics,
    # layers 2/3 are full-precision f32.
    hi = jax.lax.Precision.HIGHEST
    w1_bf = params["H1.weight"].T.astype(jnp.bfloat16)
    h1_ref = jnp.maximum(
        jnp.dot(x.astype(jnp.bfloat16), w1_bf,
                preferred_element_type=jnp.float32) + params["H1.bias"], 0.0)
    h2_ref = jnp.maximum(
        jnp.dot(h1_ref, params["H2.weight"].T, precision=hi) + params["H2.bias"], 0.0)
    out_ref = jnp.dot(h2_ref, params["fc.weight"].T, precision=hi) + params["fc.bias"]

    assert out.shape == (B, D_out)
    assert states["h1.state"].shape == (B, 8)
    assert states["h2.state"].shape == (B, 2)
    assert jnp.allclose(out, out_ref, atol=5e-3, rtol=5e-3)

    # Active-state masks must be {0,1} and agree with the reference everywhere
    # except numerically-boundary activations (|h| ~ 0), where MXU-vs-XLA
    # rounding of a value straddling zero may legitimately differ.
    m1 = states["h1.state"].astype(bool)
    m2 = states["h2.state"].astype(bool)
    r1 = h1_ref > 0
    r2 = h2_ref > 0
    assert bool(jnp.all((m1 == r1) | (h1_ref < 1e-3)))
    assert bool(jnp.all((m2 == r2) | (h2_ref < 1e-3)))
    assert bool(jnp.all((states["h1.state"] == 0) | (states["h1.state"] == 1)))
    assert bool(jnp.all((states["h2.state"] == 0) | (states["h2.state"] == 1)))

    print("KERNEL_OK")
</pallas_src>

<mosaic_0001>
module attributes {stable_mosaic.version = 11 : i64} {
  func.func @fnn_kernel(%arg0: i32, %arg1: memref<96x32xf32, #tpu.memory_space<vmem>>, %arg2: memref<32x8xbf16, #tpu.memory_space<vmem>>, %arg3: memref<8x16xf32, #tpu.memory_space<vmem>>, %arg4: memref<8x10xf32, #tpu.memory_space<vmem>>, %arg5: memref<3x128xf32, #tpu.memory_space<vmem>>, %arg6: memref<96x16xi8, #tpu.memory_space<vmem>>, %arg7: memref<96x10xf32, #tpu.memory_space<vmem>>) attributes {dimension_semantics = [#tpu.dimension_semantics<parallel>], iteration_bounds = array<i64: 3>, scalar_prefetch = 0 : i64, scratch_operands = 0 : i64, tpu.core_type = #tpu.core_type<tc>, window_params = [{transform_indices = @transform_0, window_bounds = array<i64: 96, 32>}, {pipeline_mode = #tpu.pipeline_mode<synchronous>, transform_indices = @transform_1, window_bounds = array<i64: 32, 8>}, {pipeline_mode = #tpu.pipeline_mode<synchronous>, transform_indices = @transform_2, window_bounds = array<i64: 8, 16>}, {pipeline_mode = #tpu.pipeline_mode<synchronous>, transform_indices = @transform_3, window_bounds = array<i64: 8, 10>}, {pipeline_mode = #tpu.pipeline_mode<synchronous>, transform_indices = @transform_4, window_bounds = array<i64: 3, 128>}, {transform_indices = @transform_5, window_bounds = array<i64: 96, 16>}, {transform_indices = @transform_6, window_bounds = array<i64: 96, 10>}]} {
    %c0 = arith.constant 0 : index
    %c0_0 = arith.constant 0 : index
    %0 = vector.load %arg1[%c0, %c0_0] : memref<96x32xf32, #tpu.memory_space<vmem>>, vector<96x32xf32>
    %1 = arith.truncf %0 : vector<96x32xf32> to vector<96x32xbf16>
    %c0_1 = arith.constant 0 : index
    %c0_2 = arith.constant 0 : index
    %2 = vector.load %arg2[%c0_1, %c0_2] : memref<32x8xbf16, #tpu.memory_space<vmem>>, vector<32x8xbf16>
    %cst = arith.constant dense<0.000000e+00> : vector<96x8xf32>
    %3 = tpu.matmul %1, %2, %cst {dimension_numbers = #tpu.dot_dimension_numbers<[1], [0], [0], [1], [0, 0, 1, 1], [], []>} : vector<96x32xbf16>, vector<32x8xbf16>, vector<96x8xf32> -> vector<96x8xf32>
    %c0_3 = arith.constant 0 : index
    %c0_4 = arith.constant 0 : index
    %4 = vector.load %arg5[%c0_3, %c0_4] : memref<3x128xf32, #tpu.memory_space<vmem>>, vector<1x8xf32>
    %5 = vector.broadcast %4 : vector<1x8xf32> to vector<96x8xf32>
    %6 = arith.addf %3, %5 : vector<96x8xf32>
    %cst_5 = arith.constant 0.000000e+00 : f32
    %7 = vector.broadcast %cst_5 : f32 to vector<96x8xf32>
    %8 = arith.maximumf %6, %7 : vector<96x8xf32>
    %c0_6 = arith.constant 0 : index
    %c0_7 = arith.constant 0 : index
    %9 = vector.load %arg3[%c0_6, %c0_7] : memref<8x16xf32, #tpu.memory_space<vmem>>, vector<8x16xf32>
    %cst_8 = arith.constant dense<0.000000e+00> : vector<96x16xf32>
    %10 = tpu.matmul %8, %9, %cst_8 {dimension_numbers = #tpu.dot_dimension_numbers<[1], [0], [0], [1], [0, 0, 1, 1], [], []>} : vector<96x8xf32>, vector<8x16xf32>, vector<96x16xf32> -> vector<96x16xf32>
    %c1 = arith.constant 1 : index
    %c0_9 = arith.constant 0 : index
    %11 = vector.load %arg5[%c1, %c0_9] : memref<3x128xf32, #tpu.memory_space<vmem>>, vector<1x16xf32>
    %12 = vector.broadcast %11 : vector<1x16xf32> to vector<96x16xf32>
    %13 = arith.addf %10, %12 : vector<96x16xf32>
    %cst_10 = arith.constant 0.000000e+00 : f32
    %14 = vector.broadcast %cst_10 : f32 to vector<96x16xf32>
    %15 = arith.cmpf ogt, %13, %14 : vector<96x16xf32>
    %16 = arith.extui %15 : vector<96x16xi1> to vector<96x16xi8>
    %c0_11 = arith.constant 0 : index
    %c0_12 = arith.constant 0 : index
    %17 = vector.load %arg6[%c0_11, %c0_12] : memref<96x16xi8, #tpu.memory_space<vmem>>, vector<96x16xi8>
    tpu.vector_store %arg6[%c0_11, %c0_12], %16 {strides = array<i32>} : memref<96x16xi8, #tpu.memory_space<vmem>>, vector<96x16xi8>,
    %18 = vector.extract_strided_slice %13 {offsets = [0, 8], sizes = [96, 8], strides = [1, 1]} : vector<96x16xf32> to vector<96x8xf32>
    %cst_13 = arith.constant 0.000000e+00 : f32
    %19 = vector.broadcast %cst_13 : f32 to vector<96x8xf32>
    %20 = arith.maximumf %18, %19 : vector<96x8xf32>
    %c0_14 = arith.constant 0 : index
    %c0_15 = arith.constant 0 : index
    %21 = vector.load %arg4[%c0_14, %c0_15] : memref<8x10xf32, #tpu.memory_space<vmem>>, vector<8x10xf32>
    %cst_16 = arith.constant dense<0.000000e+00> : vector<96x10xf32>
    %22 = tpu.matmul %20, %21, %cst_16 {dimension_numbers = #tpu.dot_dimension_numbers<[1], [0], [0], [1], [0, 0, 1, 1], [], []>} : vector<96x8xf32>, vector<8x10xf32>, vector<96x10xf32> -> vector<96x10xf32>
    %c2 = arith.constant 2 : index
    %c0_17 = arith.constant 0 : index
    %23 = vector.load %arg5[%c2, %c0_17] : memref<3x128xf32, #tpu.memory_space<vmem>>, vector<1x10xf32>
    %24 = vector.broadcast %23 : vector<1x10xf32> to vector<96x10xf32>
    %25 = arith.addf %22, %24 : vector<96x10xf32>
    %c0_18 = arith.constant 0 : index
    %c0_19 = arith.constant 0 : index
    %26 = vector.load %arg7[%c0_18, %c0_19] : memref<96x10xf32, #tpu.memory_space<vmem>>, vector<96x10xf32>
    tpu.vector_store %arg7[%c0_18, %c0_19], %25 {strides = array<i32>} : memref<96x10xf32, #tpu.memory_space<vmem>>, vector<96x10xf32>,
    return
  }
  func.func @transform_0(%arg0: i32) -> (i32, i32) {
    %c0_i32 = arith.constant 0 : i32
    %c0_i32_0 = arith.constant 0 : i32
    return %arg0, %c0_i32 : i32, i32
  }
  func.func @transform_1(%arg0: i32) -> (i32, i32) {
    %c0_i32 = arith.constant 0 : i32
    %c0_i32_0 = arith.constant 0 : i32
    %c0_i32_1 = arith.constant 0 : i32
    return %c0_i32, %c0_i32_0 : i32, i32
  }
  func.func @transform_2(%arg0: i32) -> (i32, i32) {
    %c0_i32 = arith.constant 0 : i32
    %c0_i32_0 = arith.constant 0 : i32
    %c0_i32_1 = arith.constant 0 : i32
    return %c0_i32, %c0_i32_0 : i32, i32
  }
  func.func @transform_3(%arg0: i32) -> (i32, i32) {
    %c0_i32 = arith.constant 0 : i32
    %c0_i32_0 = arith.constant 0 : i32
    %c0_i32_1 = arith.constant 0 : i32
    return %c0_i32, %c0_i32_0 : i32, i32
  }
  func.func @transform_4(%arg0: i32) -> (i32, i32) {
    %c0_i32 = arith.constant 0 : i32
    %c0_i32_0 = arith.constant 0 : i32
    %c0_i32_1 = arith.constant 0 : i32
    return %c0_i32, %c0_i32_0 : i32, i32
  }
  func.func @transform_5(%arg0: i32) -> (i32, i32) {
    %c0_i32 = arith.constant 0 : i32
    %c0_i32_0 = arith.constant 0 : i32
    return %arg0, %c0_i32 : i32, i32
  }
  func.func @transform_6(%arg0: i32) -> (i32, i32) {
    %c0_i32 = arith.constant 0 : i32
    %c0_i32_0 = arith.constant 0 : i32
    return %arg0, %c0_i32 : i32, i32
  }
}

</mosaic_0001>

<bundles_post_ra>
// kernel: tpu_custom_call.1
= control target key start
LH: loop header
LB: loop body
LE: loop exit
PB: predicated region body
PF: predicated region fallthrough
CT: control target
= control target key end

     0   :  { %s1907_s21 = smov 0   ;;  %s1909_s22 = smov 0   ;;  %s2211_s0 = inlined_call_operand.vmem [shape: f32[200,32], index: 0, kind: input, shape index: {}]   ;;  %s2212_s1 = inlined_call_operand.vmem [shape: bf16[32,8], index: 1, kind: input, shape index: {}]   ;;  %s2213_s2 = inlined_call_operand.vmem [shape: f32[8,16], index: 2, kind: input, shape index: {}]   ;;  %s2214_s3 = inlined_call_operand.vmem [shape: f32[8,10], index: 3, kind: input, shape index: {}]   ;;  %s2215_s4 = inlined_call_operand.vmem [shape: f32[3,128], index: 4, kind: input, shape index: {}]   ;;  %s2216_s5 = inlined_call_operand.vmem [shape: s8[200,16], index: 5, kind: output, shape index: {0}]   ;;  %s2217_s6 = inlined_call_operand.vmem [shape: f32[200,10], index: 6, kind: output, shape index: {1}]  }
   0x1   :  { %s1911_s23 = smov 0  }
   0x2 LB: > { %s1920_s24 = sadd.s32 4294967295, %s1804_s23   ;;  %s1922_s25 = sadd.s32 1, %s1804_s23   ;;  %s1804_s23 = sphi %s1911_s23, %s2233_s23   ;;  %s1800_s22 = sphi %s1909_s22, %s2232_s22   ;;  %s1796_s21 = sphi %s1907_s21, %s2231_s21  }
   0x3   : > { %s131_s26 = ssub.s32 %s1804_s23, %s1922_s25  ;;  %s134_s27 = sadd.s32 1, %s1800_s22 }
   0x4   : > { %p132_p0 = scmp.eq.s32.totalorder %s131_s26, 0  ;;  %p144_p1 = scmp.ne.s32.totalorder %s1800_s22, %s1796_s21 }
   0x5   : > { %p145_p2 = scmp.eq.s32.totalorder %s1920_s24, 2  ;;  %p1397_p3 = scmp.ge.s32.totalorder %s1804_s23, 1 }
   0x6   : > { %s1930_s28 = scalar_select %p132_p0, %s1800_s22, %s134_s27  }
   0x7   : > { %p1932_p4 = por %p145_p2, %p144_p1  ;;  %p224_p5 = scmp.lt.s32.totalorder %s1804_s23, 4 }
   0x9   : > { %p225_p6 = pnand %p1397_p3, %p224_p5 }
   0xa   : > { %v1708_v0 = vld [vmem:[%s2212_s1] sm:$0xff] (!%p225_p6)   ;;  %s1940_s8 = smul.u32 (!%p225_p6), 12, %s1920_s24  ;;  %v1709_v1 = vld [vmem:[%s2212_s1 + $0x8] sm:$0xff] (!%p225_p6)   ;;  %vm327_vm0 = vcmask (!%p225_p6), 261120   ;;  %vm445_vm1 = vcmask (!%p225_p6), 64512   ;;  %s1870_s30 = smov (!%p225_p6), 120  }
   0xb   : > { %228 = sbr.rel (%p225_p6) target bundleno = 954 (0x3ba), region = 40  ;;  %1492 = vmatprep.subr.bf16.mxu0 (!%p225_p6), %v1708_v0  ;;  %v439_v2 = vld [vmem:[%s2213_s2] sm:$0xff] (!%p225_p6)  ;;  %s252_s7 = sand.u32 (!%p225_p6), 1, %s1796_s21   ;;  %vm667_vm12 = vcmask (!%p225_p6), 123904  }
   0xc   : > { %p266_p7 = scmp.lt.s32.totalorder (!%p225_p6), %s1940_s8, 24  ;;  %1493 = vmatpush3.bf16.msra.mxu0 (!%p225_p6), %v1708_v0  ;;  %1548 = vmatprep.subr.mxu1 (!%p225_p6), %v439_v2  ;;  %v1399_v21 = vld [vmem:[%s2215_s4] ss:$0 sm:$0xff] (!%p225_p6)  ;;  %v1980_v59 = vld [vmem:[%s2215_s4 + $0x1] ss:$0 sm:$0xff] (!%p225_p6)  ;;  %s2000_s9 = smul.u32 (!%p225_p6), 24, %s252_s7 }
   0xd   : > { %1494 = vmatprep.subr.bf16.mxu0 (!%p225_p6), %v1709_v1  ;;  %1549 = vmatpush3.msra.mxu1 (!%p225_p6), %v439_v2  ;;  %v692_v58 = vld [vmem:[%s2214_s3] sm:$0xff] (!%p225_p6)  ;;  %s1551_s11 = smul.u32 (!%p225_p6), 96, %s252_s7 }
   0xe   : > { %1528 = vmatprep.subr.mxu1 (!%p225_p6), %v692_v58  ;;  %s2013_s10 = scalar_lea.vmem (!%p225_p6), [#allocation2], %s2000_s9  }
  0x10   : > { %1495 = vmatpush3.bf16.msra.mxu0 (!%p225_p6), %v1709_v1 }
  0x11   : > { %1508 = vmatprep.subr.mxu0 (!%p225_p6), %v439_v2 }
  0x12   : > { %s267_s13 = scalar_select %p266_p7, %s1940_s8, 24 }
  0x13   : > { %s908_s21 = ssub.s32 (%p1932_p4), 25, %s1940_s8  ;;  %s1456_s15 = smul.u32 (%p1932_p4), 24, %s1920_s24 }
  0x14   : > { %s1398_s14 = sshll.u32 %s267_s13, 3  ;;  %p909_p8 = scmp.lt.s32.totalorder (%p1932_p4), %s908_s21, 12 }
  0x15   : > { %s269_s17 = scalar_lea.vmem %s2211_s0, %s1398_s14  ;;  %s2077_s14 = scalar_lea.vmem [#allocation3], %s1551_s11  }
  0x16   : > { %v288_v3 = vld [vmem:[%s269_s17] sm:$0xff]  ;;  %v289_v4 = vld [vmem:[%s269_s17 + $0x8] sm:$0xff]  ;;  %v290_v5 = vld [vmem:[%s269_s17 + $0x10] sm:$0xff]  ;;  %s2110_s18 = scalar_lea.vmem (%p1932_p4), %s2216_s5, %s1456_s15  }
  0x17   : > { %v300_v6 = vpack.c.bf16 %v289_v4, %v288_v3  ;;  %v291_v7 = vld [vmem:[%s269_s17 + $0x18] sm:$0xff]  ;;  %v292_v8 = vld [vmem:[%s269_s17 + $0x20] sm:$0xff]  ;;  %v293_v9 = vld [vmem:[%s269_s17 + $0x28] sm:$0xff] }
  0x18   : > { %v301_v10 = vpack.c.bf16 %v291_v7, %v290_v5  ;;  %v302_v11 = vpack.c.bf16 %v293_v9, %v292_v8  ;;  %v294_v12 = vld [vmem:[%s269_s17 + $0x30] sm:$0xff]  ;;  %v295_v13 = vld [vmem:[%s269_s17 + $0x38] sm:$0xff]  ;;  %v296_v14 = vld [vmem:[%s269_s17 + $0x40] sm:$0xff] }
  0x19   : > { %1496 = vmatprep.mubr.msk.bf16.mxu0 %vm327_vm0, %v300_v6  ;;  %v297_v15 = vld [vmem:[%s269_s17 + $0x48] sm:$0xff]  ;;  %v303_v16 = vpack.c.bf16 %v295_v13, %v294_v12  ;;  %v298_v18 = vld [vmem:[%s269_s17 + $0x50] sm:$0xff]  ;;  %v299_v19 = vld [vmem:[%s269_s17 + $0x58] sm:$0xff]  ;;  %v1871_v13 = vmov 0  }
  0x1a   : > { %1497 = vmatmul.mubr.msk.bf16.vlgmr.msra.gmra.mrb[0].mxu0 %vm327_vm0, %v301_v10  ;;  %v304_v17 = vpack.c.bf16 %v297_v15, %v296_v14  ;;  %v305_v20 = vpack.c.bf16 %v299_v19, %v298_v18 }
  0x1b   : > { %1500 = vmatprep.mubr.msk.bf16.mxu0 %vm327_vm0, %v302_v11  ;;  %1509 = vmatpush3.msra.mxu0 %v439_v2 }
  0x22   : > { %1501 = vmatmul.mubr.msk.bf16.gmra.mrb[4].mxu0 %vm327_vm0, %v303_v16 }
  0x23   : > { %1504 = vmatprep.mubr.msk.bf16.mxu0 %vm327_vm0, %v304_v17 }
  0x2a   : > { %1505 = vmatmul.mubr.msk.bf16.gmra.mrb[8].mxu0 %vm327_vm0, %v305_v20 }
  0xed   : > { %v1498_v22 = vpop.f32.mrb[0].mxu0 }
  0xee   : > { %v380_v23 = vpop.f32.mrb[1].mxu0  ;;  %v389_v26 = vadd.f32 %v1498_v22, %v1399_v21 }
  0xef   : > { %v381_v24 = vadd.f32 %v1399_v21, %v380_v23  ;;  %v1499_v25 = vpop.f32.mrb[2].mxu0 }
  0xf0   : > { %v383_v27 = vpop.f32.mrb[3].mxu0  ;;  %v392_v30 = vadd.f32 %v1499_v25, %v1399_v21  ;;  %v429_v32 = vmax.f32 %v389_v26, 0.0 }
  0xf1   : > { %v427_v28 = vmax.f32 %v381_v24, 0.0  ;;  %v384_v29 = vadd.f32 %v1399_v21, %v383_v27 }
  0xf2   : > { %v430_v36 = vmax.f32 %v392_v30, 0.0 }
  0xf3   : > { %v428_v31 = vmax.f32 %v384_v29, 0.0  ;;  %1510 = vmatprep.mubr.msk.f32.mxu0 %vm445_vm1, %v427_v28 }
  0xf5   : > { %v1502_v33 = vpop.f32.mrb[4].mxu0  ;;  %1511 = vmatmul.mubr.msk.f32.vlgmr.msra.gmra.mrb[12].mxu0 %vm445_vm1, %v428_v31 }
  0xf6   : > { %v405_v34 = vadd.f32 %v1502_v33, %v1399_v21  ;;  %v396_v35 = vpop.f32.mrb[5].mxu0  ;;  %1513 = vmatprep.mubr.msk.f32.mxu0 %vm445_vm1, %v429_v32 }
  0xf7   : > { %v397_v37 = vadd.f32 %v1399_v21, %v396_v35  ;;  %v1503_v38 = vpop.f32.mrb[6].mxu0 }
  0xf8   : > { %v399_v39 = vpop.f32.mrb[7].mxu0  ;;  %v433_v42 = vmax.f32 %v405_v34, 0.0  ;;  %v408_v43 = vadd.f32 %v1503_v38, %v1399_v21 }
  0xf9   : > { %v431_v40 = vmax.f32 %v397_v37, 0.0  ;;  %v400_v41 = vadd.f32 %v1399_v21, %v399_v39  ;;  %1514 = vmatmul.mubr.msk.f32.gmra.mrb[14].mxu0 %vm445_vm1, %v430_v36 }
  0xfa   : > { %v434_v48 = vmax.f32 %v408_v43, 0.0 }
  0xfb   : > { %v432_v44 = vmax.f32 %v400_v41, 0.0  ;;  %1516 = vmatprep.mubr.msk.f32.mxu1 %vm445_vm1, %v431_v40 }
  0xfd   : > { %v1506_v45 = vpop.f32.mrb[8].mxu0  ;;  %1517 = vmatmul.mubr.msk.f32.vlgmr.msra.gmra.mrb[0].mxu1 %vm445_vm1, %v432_v44 }
  0xfe   : > { %v421_v46 = vadd.f32 %v1506_v45, %v1399_v21  ;;  %v412_v47 = vpop.f32.mrb[9].mxu0  ;;  %1519 = vmatprep.mubr.msk.f32.mxu1 %vm445_vm1, %v433_v42  ;;  %1529 = vmatpush3.msra.mxu1 %v692_v58 }
  0xff   : > { %v413_v49 = vadd.f32 %v1399_v21, %v412_v47  ;;  %v1507_v50 = vpop.f32.mrb[10].mxu0 }
 0x100   : > { %v415_v51 = vpop.f32.mrb[11].mxu0  ;;  %v437_v54 = vmax.f32 %v421_v46, 0.0  ;;  %v424_v55 = vadd.f32 %v1507_v50, %v1399_v21 }
 0x101   : > { %v435_v52 = vmax.f32 %v413_v49, 0.0  ;;  %v416_v53 = vadd.f32 %v1399_v21, %v415_v51  ;;  %1520 = vmatmul.mubr.msk.f32.gmra.mrb[2].mxu1 %vm445_vm1, %v434_v48 }
 0x102   : > { %v438_v57 = vmax.f32 %v424_v55, 0.0 }
 0x103   : > { %v436_v56 = vmax.f32 %v416_v53, 0.0  ;;  %1522 = vmatprep.mubr.msk.f32.mxu1 %vm445_vm1, %v435_v52 }
 0x105   : > { %1523 = vmatmul.mubr.msk.f32.gmra.mrb[4].mxu1 %vm445_vm1, %v436_v56 }
 0x106   : > { %1525 = vmatprep.mubr.msk.f32.mxu1 %vm445_vm1, %v437_v54 }
 0x109   : > { %1526 = vmatmul.mubr.msk.f32.gmra.mrb[6].mxu1 %vm445_vm1, %v438_v57 }
 0x1c8   : > { %v1512_v60 = vpop.f32.mrb[12].mxu0 }
 0x1c9   : > { %v554_v61 = vadd.f32 %v1512_v60, %v1980_v59  ;;  %v548_v62 = vpop.f32.mrb[13].mxu0 }
 0x1ca   : > { %v549_v63 = vadd.f32 %v1980_v59, %v548_v62 }
 0x1cb   : > { %vm608_vm2 = vcmp.gt.f32.partialorder %v554_v61, 0.0  ;;  %v681_v6 = vmax.f32 %v554_v61, 0.0 }
 0x1cc   : > { %vm607_vm3 = vcmp.gt.f32.partialorder %v549_v63, 0.0  ;;  %v1515_v0 = vpop.f32.mrb[14].mxu0  ;;  %v680_v1 = vmax.f32 %v549_v63, 0.0 }
 0x1cd   : > { %vm1984_vm4 = vmpackc.low %vm608_vm2, %vm607_vm3  ;;  %v564_v3 = vadd.f32 %v1515_v0, %v1980_v59  ;;  %v558_v4 = vpop.f32.mrb[15].mxu0 }
 0x1ce   : > { %v559_v5 = vadd.f32 %v1980_v59, %v558_v4  ;;  %710 = vrot.lane.b32.xlu0 %v680_v1, %s1870_s30 }
 0x1cf   : > { %vm610_vm5 = vcmp.gt.f32.partialorder %v564_v3, 0.0  ;;  %v683_v12 = vmax.f32 %v564_v3, 0.0 }
 0x1d0   : > { %vm609_vm6 = vcmp.gt.f32.partialorder %v559_v5, 0.0  ;;  %v1518_v7 = vpop.f32.mrb[0].mxu1  ;;  %v682_v8 = vmax.f32 %v559_v5, 0.0 }
 0x1d1   : > { %vm620_vm7 = vmpackc.low %vm610_vm5, %vm609_vm6  ;;  %v574_v9 = vadd.f32 %v1518_v7, %v1980_v59  ;;  %v568_v10 = vpop.f32.mrb[1].mxu1 }
 0x1d2   : > { %vm621_vm8 = vmpackc.even %vm620_vm7, %vm1984_vm4  ;;  %v569_v11 = vadd.f32 %v1980_v59, %v568_v10  ;;  %714 = vrot.lane.b32.xlu1 %v682_v8, %s1870_s30  ;;  %712 = vrot.lane.b32.xlu0 %v681_v6, %s1870_s30 }
 0x1d3   : > { %v628_v14 = vsel %vm621_vm8, 16843009, %v1871_v13  ;;  %vm612_vm9 = vcmp.gt.f32.partialorder %v574_v9, 0.0  ;;  %v685_v28 = vmax.f32 %v574_v9, 0.0 }
 0x1d4   : > { %v631_v15 = vunpack.c.0.s8 %v628_v14  ;;  %v632_v16 = vunpack.c.1.s8 %v628_v14  ;;  %v633_v17 = vunpack.c.2.s8 %v628_v14  ;;  %v634_v18 = vunpack.c.3.s8 %v628_v14  ;;  %v1521_v19 = vpop.f32.mrb[2].mxu1 }
 0x1d5   : > { %vm611_vm10 = vcmp.gt.f32.partialorder %v569_v11, 0.0  ;;  %v684_v20 = vmax.f32 %v569_v11, 0.0  ;;  %v584_v21 = vadd.f32 %v1521_v19, %v1980_v59  ;;  %v578_v22 = vpop.f32.mrb[3].mxu1 }
 0x1d6   : > { %v643_v23 = vpack.c.b16 %v631_v15, %v631_v15  ;;  %v645_v24 = vpack.c.b16 %v632_v16, %v632_v16  ;;  %v647_v25 = vpack.c.b16 %v633_v17, %v633_v17  ;;  %v649_v26 = vpack.c.b16 %v634_v18, %v634_v18  ;;  %vm2004_vm11 = vmpackc.low %vm612_vm9, %vm611_vm10  ;;  %716 = vrot.lane.b32.xlu1 %v683_v12, %s1870_s30 }
 0x1d7   : > { %vm614_vm13 = vcmp.gt.f32.partialorder %v584_v21, 0.0  ;;  %v579_v29 = vadd.f32 %v1980_v59, %v578_v22  ;;  %718 = vrot.lane.b32.xlu0 %v684_v20, %s1870_s30  ;;  %v687_v39 = vmax.f32 %v584_v21, 0.0  ;;  %vm883_vm9 = vcmask 80896  }
 0x1d8   : > { %v644_v30 = vpack.c.b8 %v643_v23, %v643_v23  ;;  %v646_v31 = vpack.c.b8 %v645_v24, %v645_v24  ;;  %v648_v32 = vpack.c.b8 %v647_v25, %v647_v25  ;;  %v650_v33 = vpack.c.b8 %v649_v26, %v649_v26  ;;  %v1524_v34 = vpop.f32.mrb[4].mxu1  ;;  %v1421_v23 = vld [vmem:[%s2215_s4 + $0x2] ss:$0 sm:$0xff] }
 0x1d9   : > { %vm613_vm14 = vcmp.gt.f32.partialorder %v579_v29, 0.0  ;;  %v686_v35 = vmax.f32 %v579_v29, 0.0  ;;  %v594_v36 = vadd.f32 %v1524_v34, %v1980_v59  ;;  %v588_v37 = vpop.f32.mrb[5].mxu1 }
 0x1da   : > { %668 = vst.msk [vmem:[%s2013_s10] sm:$0x3] %vm667_vm12, %v644_v30  ;;  %669 = vst.msk [vmem:[%s2013_s10 + $0x2] sm:$0x3] %vm667_vm12, %v646_v31  ;;  %v589_v38 = vadd.f32 %v1980_v59, %v588_v37  ;;  %720 = vrot.lane.b32.xlu1 %v685_v28, %s1870_s30 }
 0x1db   : > { %670 = vst.msk [vmem:[%s2013_s10 + $0x4] sm:$0x3] %vm667_vm12, %v648_v32  ;;  %671 = vst.msk [vmem:[%s2013_s10 + $0x6] sm:$0x3] %vm667_vm12, %v650_v33  ;;  %vm616_vm2 = vcmp.gt.f32.partialorder %v594_v36, 0.0  ;;  %722 = vrot.lane.b32.xlu0 %v686_v35, %s1870_s30  ;;  %v689_v55 = vmax.f32 %v594_v36, 0.0 }
 0x1dc   : > { %vm623_vm15 = vmpackc.low %vm614_vm13, %vm613_vm14  ;;  %vm615_vm3 = vcmp.gt.f32.partialorder %v589_v38, 0.0  ;;  %v688_v41 = vmax.f32 %v589_v38, 0.0  ;;  %v1527_v42 = vpop.f32.mrb[6].mxu1 }
 0x1dd   : > { %vm624_vm0 = vmpackc.even %vm623_vm15, %vm2004_vm11  ;;  %v598_v48 = vpop.f32.mrb[7].mxu1  ;;  %v604_v49 = vadd.f32 %v1527_v42, %v1980_v59 }
 0x1de   : > { %v629_v40 = vsel %vm624_vm0, 16843009, %v1871_v13  ;;  %vm2030_vm4 = vmpackc.low %vm616_vm2, %vm615_vm3  ;;  %v599_v50 = vadd.f32 %v1980_v59, %v598_v48  ;;  %724 = vrot.lane.b32.xlu1 %v687_v39, %s1870_s30 }
 0x1df   : > { %v635_v43 = vunpack.c.0.s8 %v629_v40  ;;  %v636_v44 = vunpack.c.1.s8 %v629_v40  ;;  %v637_v45 = vunpack.c.2.s8 %v629_v40  ;;  %v638_v46 = vunpack.c.3.s8 %v629_v40  ;;  %726 = vrot.lane.b32.xlu0 %v688_v41, %s1870_s30 }
 0x1e0   : > { %vm618_vm5 = vcmp.gt.f32.partialorder %v604_v49, 0.0  ;;  %vm617_vm6 = vcmp.gt.f32.partialorder %v599_v50, 0.0  ;;  %v690_v56 = vmax.f32 %v599_v50, 0.0  ;;  %v691_v61 = vmax.f32 %v604_v49, 0.0 }
 0x1e1   : > { %v651_v51 = vpack.c.b16 %v635_v43, %v635_v43  ;;  %v653_v52 = vpack.c.b16 %v636_v44, %v636_v44  ;;  %v655_v53 = vpack.c.b16 %v637_v45, %v637_v45  ;;  %v657_v54 = vpack.c.b16 %v638_v46, %v638_v46  ;;  %vm626_vm7 = vmpackc.low %vm618_vm5, %vm617_vm6 }
 0x1e2   : > { %vm627_vm8 = vmpackc.even %vm626_vm7, %vm2030_vm4  ;;  %728 = vrot.lane.b32.xlu1 %v689_v55, %s1870_s30 }
 0x1e3   : > { %v652_v57 = vpack.c.b8 %v651_v51, %v651_v51  ;;  %v654_v58 = vpack.c.b8 %v653_v52, %v653_v52  ;;  %v656_v60 = vpack.c.b8 %v655_v53, %v655_v53  ;;  %v658_v59 = vpack.c.b8 %v657_v54, %v657_v54  ;;  %730 = vrot.lane.b32.xlu0 %v690_v56, %s1870_s30 }
 0x1e4   : > { %v630_v62 = vsel %vm627_vm8, 16843009, %v1871_v13 }
 0x1e5   : > { %672 = vst.msk [vmem:[%s2013_s10 + $0x8] sm:$0x3] %vm667_vm12, %v652_v57  ;;  %673 = vst.msk [vmem:[%s2013_s10 + $0xa] sm:$0x3] %vm667_vm12, %v654_v58  ;;  %v639_v63 = vunpack.c.0.s8 %v630_v62  ;;  %v640_v0 = vunpack.c.1.s8 %v630_v62  ;;  %v641_v1 = vunpack.c.2.s8 %v630_v62  ;;  %v642_v2 = vunpack.c.3.s8 %v630_v62 }
 0x1e6   : > { %674 = vst.msk [vmem:[%s2013_s10 + $0xc] sm:$0x3] %vm667_vm12, %v656_v60  ;;  %675 = vst.msk [vmem:[%s2013_s10 + $0xe] sm:$0x3] %vm667_vm12, %v658_v59  ;;  %732 = vrot.lane.b32.xlu1 %v691_v61, %s1870_s30 }
 0x1e7   : > { %v659_v3 = vpack.c.b16 %v639_v63, %v639_v63  ;;  %v661_v4 = vpack.c.b16 %v640_v0, %v640_v0  ;;  %v663_v5 = vpack.c.b16 %v641_v1, %v641_v1  ;;  %v665_v6 = vpack.c.b16 %v642_v2, %v642_v2 }
 0x1e9   : > { %v660_v7 = vpack.c.b8 %v659_v3, %v659_v3  ;;  %v662_v8 = vpack.c.b8 %v661_v4, %v661_v4  ;;  %v664_v9 = vpack.c.b8 %v663_v5, %v663_v5  ;;  %v666_v10 = vpack.c.b8 %v665_v6, %v665_v6 }
 0x1eb   : > { %676 = vst.msk [vmem:[%s2013_s10 + $0x10] sm:$0x3] %vm667_vm12, %v660_v7  ;;  %677 = vst.msk [vmem:[%s2013_s10 + $0x12] sm:$0x3] %vm667_vm12, %v662_v8 }
 0x1ec   : > { %678 = vst.msk [vmem:[%s2013_s10 + $0x14] sm:$0x3] %vm667_vm12, %v664_v9  ;;  %679 = vst.msk [vmem:[%s2013_s10 + $0x16] sm:$0x3] %vm667_vm12, %v666_v10 }
 0x240   : > { %v711_v11 = vpop.permute.xlu0 %710 }
 0x241   : > { %1530 = vmatprep.mubr.msk.f32.mxu1 %vm445_vm1, %v711_v11 }
 0x244   : > { %v715_v12 = vpop.permute.xlu1 %714  ;;  %v713_v13 = vpop.permute.xlu0 %712 }
 0x245   : > { %1531 = vmatmul.mubr.msk.f32.vlgmr.msra.gmra.mrb[8].mxu1 %vm445_vm1, %v713_v13 }
 0x246   : > { %1533 = vmatprep.mubr.msk.f32.mxu1 %vm445_vm1, %v715_v12 }
 0x248   : > { %v717_v14 = vpop.permute.xlu1 %716 }
 0x249   : > { %v719_v15 = vpop.permute.xlu0 %718  ;;  %1534 = vmatmul.mubr.msk.f32.gmra.mrb[10].mxu1 %vm445_vm1, %v717_v14 }
 0x24a   : > { %1536 = vmatprep.mubr.msk.f32.mxu1 %vm445_vm1, %v719_v15 }
 0x24c   : > { %v721_v16 = vpop.permute.xlu1 %720 }
 0x24d   : > { %v723_v17 = vpop.permute.xlu0 %722  ;;  %1537 = vmatmul.mubr.msk.f32.gmra.mrb[12].mxu1 %vm445_vm1, %v721_v16 }
 0x24e   : > { %1539 = vmatprep.mubr.msk.f32.mxu1 %vm445_vm1, %v723_v17 }
 0x250   : > { %v725_v18 = vpop.permute.xlu1 %724 }
 0x251   : > { %v727_v19 = vpop.permute.xlu0 %726  ;;  %1540 = vmatmul.mubr.msk.f32.gmra.mrb[14].mxu1 %vm445_vm1, %v725_v18 }
 0x252   : > { %1542 = vmatprep.mubr.msk.f32.mxu1 %vm445_vm1, %v727_v19 }
 0x254   : > { %v729_v20 = vpop.permute.xlu1 %728 }
 0x255   : > { %v731_v21 = vpop.permute.xlu0 %730  ;;  %1543 = vmatmul.mubr.msk.f32.gmra.mrb[16].mxu1 %vm445_vm1, %v729_v20 }
 0x256   : > { %1545 = vmatprep.mubr.msk.f32.mxu1 %vm445_vm1, %v731_v21 }
 0x258   : > { %v733_v22 = vpop.permute.xlu1 %732 }
 0x259   : > { %1546 = vmatmul.mubr.msk.f32.gmra.mrb[18].mxu1 %vm445_vm1, %v733_v22 }
 0x318   : > { %v1532_v24 = vpop.f32.mrb[8].mxu1 }
 0x319   : > { %v830_v25 = vadd.f32 %v1532_v24, %v1421_v23  ;;  %v824_v26 = vpop.f32.mrb[9].mxu1 }
 0x31a   : > { %v825_v27 = vadd.f32 %v1421_v23, %v824_v26 }
 0x31b   : > { %885 = vst.msk [vmem:[%s2077_s14 + $0x8] sm:$0xff] %vm883_vm9, %v830_v25 }
 0x31c   : > { %884 = vst.msk [vmem:[%s2077_s14] sm:$0xff] %vm883_vm9, %v825_v27  ;;  %v1535_v28 = vpop.f32.mrb[10].mxu1 }
 0x31d   : > { %v840_v29 = vadd.f32 %v1535_v28, %v1421_v23  ;;  %v834_v30 = vpop.f32.mrb[11].mxu1 }
 0x31e   : > { %v835_v31 = vadd.f32 %v1421_v23, %v834_v30 }
 0x31f   : > { %887 = vst.msk [vmem:[%s2077_s14 + $0x18] sm:$0xff] %vm883_vm9, %v840_v29 }
 0x320   : > { %886 = vst.msk [vmem:[%s2077_s14 + $0x10] sm:$0xff] %vm883_vm9, %v835_v31  ;;  %v1538_v32 = vpop.f32.mrb[12].mxu1 }
 0x321   : > { %v850_v33 = vadd.f32 %v1538_v32, %v1421_v23  ;;  %v844_v34 = vpop.f32.mrb[13].mxu1 }
 0x322   : > { %v845_v35 = vadd.f32 %v1421_v23, %v844_v34 }
 0x323   : > { %889 = vst.msk [vmem:[%s2077_s14 + $0x28] sm:$0xff] %vm883_vm9, %v850_v33 }
 0x324   : > { %888 = vst.msk [vmem:[%s2077_s14 + $0x20] sm:$0xff] %vm883_vm9, %v845_v35  ;;  %v1541_v36 = vpop.f32.mrb[14].mxu1 }
 0x325   : > { %v860_v37 = vadd.f32 %v1541_v36, %v1421_v23  ;;  %v854_v38 = vpop.f32.mrb[15].mxu1 }
 0x326   : > { %v855_v39 = vadd.f32 %v1421_v23, %v854_v38 }
 0x327   : > { %891 = vst.msk [vmem:[%s2077_s14 + $0x38] sm:$0xff] %vm883_vm9, %v860_v37 }
 0x328   : > { %890 = vst.msk [vmem:[%s2077_s14 + $0x30] sm:$0xff] %vm883_vm9, %v855_v39  ;;  %v1544_v40 = vpop.f32.mrb[16].mxu1 }
 0x329   : > { %v870_v41 = vadd.f32 %v1544_v40, %v1421_v23  ;;  %v864_v42 = vpop.f32.mrb[17].mxu1 }
 0x32a   : > { %v865_v43 = vadd.f32 %v1421_v23, %v864_v42  ;;  %906 = sbr.rel (!%p1932_p4) target bundleno = 886 (0x376), region = 44 }
 0x32b   : > { %893 = vst.msk [vmem:[%s2077_s14 + $0x48] sm:$0xff] %vm883_vm9, %v870_v41 }
 0x32c   : > { %892 = vst.msk [vmem:[%s2077_s14 + $0x40] sm:$0xff] %vm883_vm9, %v865_v43  ;;  %v1547_v44 = vpop.f32.mrb[18].mxu1 }
 0x32d   : > { %v880_v45 = vadd.f32 %v1547_v44, %v1421_v23  ;;  %v874_v46 = vpop.f32.mrb[19].mxu1 }
 0x32e   : > { %v875_v47 = vadd.f32 %v1421_v23, %v874_v46 }
 0x32f   : > { %895 = vst.msk [vmem:[%s2077_s14 + $0x58] sm:$0xff] %vm883_vm9, %v880_v45 }
 0x330   : > { %894 = vst.msk [vmem:[%s2077_s14 + $0x50] sm:$0xff] %vm883_vm9, %v875_v47 }
 0x331   : > { %s2235_s21 = smov (!%p909_p8, %s908_s21), 12 }
 0x332   : > { %s1434_s19 = sshll.u32 %s2235_s21, 5 }
 0x333   : > { %p1437_p9 = scmp.eq.s32.totalorder %s1434_s19, 0 }
 0x334   : > { %1710 = sdivrem.u32 (!%p1437_p9), %s2235_s21, 12 }
 0x335   : > { %917 = sbr.rel (%p1437_p9) target bundleno = 886 (0x376), region = 48 }
 0x33d   : > { %s2116_s20 = spop.drf %1710 }
 0x33e   : > { %p1438_p10 = scmp.le.s32.totalorder %s2116_s20, 0 }
 0x33f   : > { %s2225_s23 = smov (!%p1438_p10), %s2110_s18  ;;  %s2226_s26 = smov (!%p1438_p10), %s2013_s10 }
 0x340   : > { %1313 = sbr.rel (%p1438_p10) target bundleno = 857 (0x359), region = 192  ;;  %s2125_s27 = smov (!%p1438_p10), 0  }
 0x341   : > { %s2127_s30 = smov (!%p1438_p10), 0  }
 0x347 LB: >> { %v934_v48 = vld [vmem:[%s1812_s26] sm:$0x3]  ;;  %v936_v49 = vld [vmem:[%s1812_s26 + $0x2] sm:$0x3]  ;;  %v938_v50 = vld [vmem:[%s1812_s26 + $0x4] sm:$0x3]  ;;  %s1820_s30 = sphi %s2127_s30, %s928_s30   ;;  %s1816_s27 = sphi %s2125_s27, %s2227_s27   ;;  %s1812_s26 = sphi %s2226_s26, %s963_s26   ;;  %s1808_s23 = sphi %s2225_s23, %s964_s23  }
 0x348   : >> { %935 = vst [vmem:[%s1808_s23] sm:$0x3] %v934_v48  ;;  %937 = vst [vmem:[%s1808_s23 + $0x2] sm:$0x3] %v936_v49  ;;  %v940_v51 = vld [vmem:[%s1812_s26 + $0x6] sm:$0x3]  ;;  %s958_s7 = sadd.s32 1, %s1816_s27 }
 0x349   : >> { %939 = vst [vmem:[%s1808_s23 + $0x4] sm:$0x3] %v938_v50  ;;  %v942_v52 = vld [vmem:[%s1812_s26 + $0x8] sm:$0x3]  ;;  %v944_v53 = vld [vmem:[%s1812_s26 + $0xa] sm:$0x3]  ;;  %p959_p11 = scmp.ge.s32.totalorder %s958_s7, %s2116_s20 }
 0x34a   : >> { %941 = vst [vmem:[%s1808_s23 + $0x6] sm:$0x3] %v940_v51  ;;  %943 = vst [vmem:[%s1808_s23 + $0x8] sm:$0x3] %v942_v52  ;;  %v946_v54 = vld [vmem:[%s1812_s26 + $0xc] sm:$0x3] }
 0x34b   : >> { %945 = vst [vmem:[%s1808_s23 + $0xa] sm:$0x3] %v944_v53  ;;  %v948_v55 = vld [vmem:[%s1812_s26 + $0xe] sm:$0x3]  ;;  %v950_v56 = vld [vmem:[%s1812_s26 + $0x10] sm:$0x3] }
 0x34c   : >> { %947 = vst [vmem:[%s1808_s23 + $0xc] sm:$0x3] %v946_v54  ;;  %949 = vst [vmem:[%s1808_s23 + $0xe] sm:$0x3] %v948_v55  ;;  %v952_v57 = vld [vmem:[%s1812_s26 + $0x12] sm:$0x3] }
 0x34d   : >> { %951 = vst [vmem:[%s1808_s23 + $0x10] sm:$0x3] %v950_v56  ;;  %v954_v58 = vld [vmem:[%s1812_s26 + $0x14] sm:$0x3]  ;;  %v956_v60 = vld [vmem:[%s1812_s26 + $0x16] sm:$0x3] }
 0x34e   : >> { %953 = vst [vmem:[%s1808_s23 + $0x12] sm:$0x3] %v952_v57  ;;  %955 = vst [vmem:[%s1808_s23 + $0x14] sm:$0x3] %v954_v58  ;;  %s2237_s7 = smov (%p959_p11, %s958_s7), 0  ;;  %s928_s30 = sadd.s32 1, %s1820_s30  }
 0x34f   : >> { %957 = vst [vmem:[%s1808_s23 + $0x16] sm:$0x3] %v956_v60  ;;  %s961_s9 = smul.u32 24, %s2237_s7  ;;  %p927_p12 = scmp.ge.s32.totalorder %s928_s30, %s2116_s20 }
 0x350   : >> { %s2227_s27 = smov %s2237_s7 }
 0x351   : >> { %s963_s26 = scalar_lea.vmem %s2013_s10, %s961_s9 [#allocation2]   ;;  %s964_s23 = scalar_lea.vmem %s2110_s18, %s961_s9  }
 0x352   : > { %930 = sbr.rel (!%p927_p12) target bundleno = 839 (0x347), region = 198 }
 0x359 PF: > { %1712 = sdivrem.u32 %s2235_s21, 12 }
 0x35a   : > { %s1439_s11 = smul.u32 24, %s2116_s20 }
 0x35c   : > { %s969_s12 = scalar_lea.vmem %s2013_s10, %s1439_s11 [#allocation2]   ;;  %s971_s13 = scalar_lea.vmem %s2110_s18, %s1439_s11  }
 0x362   : > { %s1713_s15 = spop.drf %1712 }
 0x363   : > { %p1441_p13 = scmp.le.s32.totalorder %s1713_s15, 0 }
 0x364   : > { %s1822_s16 = smov (!%p1441_p13), %s971_s13   ;;  %s1826_s17 = smov (!%p1441_p13), %s969_s12  }
 0x365   : > { %1327 = sbr.rel (%p1441_p13) target bundleno = 886 (0x376), region = 203  ;;  %s1830_s19 = smov (!%p1441_p13), 0  }
 0x366   : > { %s1834_s9 = smov (!%p1441_p13), 0  }
 0x36c LB: >> { %v981_v59 = vld [vmem:[%s1828_s17] sm:$0x3]  ;;  %s983_s23 = sadd.s32 1, %s1832_s19  ;;  %s975_s9 = sadd.s32 1, %s1836_s9   ;;  %s1836_s9 = sphi %s1834_s9, %s975_s9   ;;  %s1832_s19 = sphi %s1830_s19, %s1831_s19   ;;  %s1828_s17 = sphi %s1826_s17, %s988_s17   ;;  %s1824_s16 = sphi %s1822_s16, %s989_s16  }
 0x36d   : >> { %982 = vst [vmem:[%s1824_s16] sm:$0x3] %v981_v59  ;;  %p984_p0 = scmp.ge.s32.totalorder %s983_s23, %s1713_s15  ;;  %p974_p1 = scmp.ge.s32.totalorder %s975_s9, %s1713_s15 }
 0x36f   : >> { %s2239_s23 = smov (%p984_p0, %s983_s23), 0  ;;  %977 = sbr.rel (!%p974_p1) target bundleno = 876 (0x36c), region = 209 }
 0x370   : >> { %s1442_s10 = sshll.u32 %s2239_s23, 1  ;;  %s1831_s19 = smov %s2239_s23  }
 0x371   : >> { %s988_s17 = scalar_lea.vmem %s969_s12, %s1442_s10 [#allocation2]   ;;  %s989_s16 = scalar_lea.vmem %s971_s13, %s1442_s10  }
 0x376 PF: > { %1063 = sbr.rel (!%p1932_p4) target bundleno = 954 (0x3ba), region = 92  ;;  %s1065_s21 = ssub.s32 (%p1932_p4), 25, %s1940_s8 }
 0x377   : > { %s1457_s18 = smul.u32 (%p1932_p4), 96, %s1920_s24  ;;  %p1066_p2 = scmp.lt.s32.totalorder (%p1932_p4), %s1065_s21, 12 }
 0x379   : > { %s2159_s27 = scalar_lea.vmem (%p1932_p4), %s2217_s6, %s1457_s18  }
 0x37d   : > { %s2241_s21 = smov (!%p1066_p2, %s1065_s21), 12 }
 0x37e   : > { %s1444_s30 = sshll.u32 %s2241_s21, 7 }
 0x37f   : > { %p1447_p3 = scmp.eq.s32.totalorder %s1444_s30, 0 }
 0x380   : > { %1714 = sdivrem.u32 (!%p1447_p3), %s2241_s21, 12 }
 0x381   : > { %1074 = sbr.rel (%p1447_p3) target bundleno = 954 (0x3ba), region = 96 }
 0x389   : > { %s2165_s29 = spop.drf %1714 }
 0x38a   : > { %p1448_p4 = scmp.le.s32.totalorder %s2165_s29, 0 }
 0x38b   : > { %s2228_s24 = smov (!%p1448_p4), %s2159_s27  ;;  %s2229_s8 = smov (!%p1448_p4), %s2077_s14 }
 0x38c   : > { %1341 = sbr.rel (%p1448_p4) target bundleno = 925 (0x39d), region = 214  ;;  %s2174_s7 = smov (!%p1448_p4), 0  }
 0x38d   : > { %s2176_s11 = smov (!%p1448_p4), 0  }
 0x393 LB: >> { %v1160_v61 = vld [vmem:[%s1844_s8] sm:$0xff]  ;;  %v1162_v62 = vld [vmem:[%s1844_s8 + $0x8] sm:$0xff]  ;;  %v1164_v63 = vld [vmem:[%s1844_s8 + $0x10] sm:$0xff]  ;;  %s1184_s12 = sadd.s32 1, %s1848_s7  ;;  %s1154_s11 = sadd.s32 1, %s1852_s11   ;;  %s1852_s11 = sphi %s2176_s11, %s1154_s11   ;;  %s1848_s7 = sphi %s2174_s7, %s2230_s7   ;;  %s1844_s8 = sphi %s2229_s8, %s1189_s8   ;;  %s1840_s24 = sphi %s2228_s24, %s1190_s24  }
 0x394   : >> { %1161 = vst [vmem:[%s1840_s24] sm:$0xff] %v1160_v61  ;;  %1163 = vst [vmem:[%s1840_s24 + $0x8] sm:$0xff] %v1162_v62  ;;  %v1166_v0 = vld [vmem:[%s1844_s8 + $0x18] sm:$0xff]  ;;  %v1168_v1 = vld [vmem:[%s1844_s8 + $0x20] sm:$0xff]  ;;  %p1185_p5 = scmp.ge.s32.totalorder %s1184_s12, %s2165_s29  ;;  %p1153_p6 = scmp.ge.s32.totalorder %s1154_s11, %s2165_s29 }
 0x395   : >> { %1165 = vst [vmem:[%s1840_s24 + $0x10] sm:$0xff] %v1164_v63  ;;  %v1170_v2 = vld [vmem:[%s1844_s8 + $0x28] sm:$0xff]  ;;  %1167 = vst [vmem:[%s1840_s24 + $0x18] sm:$0xff] %v1166_v0  ;;  %v1172_v3 = vld [vmem:[%s1844_s8 + $0x30] sm:$0xff] }
 0x396   : >> { %1169 = vst [vmem:[%s1840_s24 + $0x20] sm:$0xff] %v1168_v1  ;;  %1171 = vst [vmem:[%s1840_s24 + $0x28] sm:$0xff] %v1170_v2  ;;  %v1174_v4 = vld [vmem:[%s1844_s8 + $0x38] sm:$0xff]  ;;  %v1176_v5 = vld [vmem:[%s1844_s8 + $0x40] sm:$0xff]  ;;  %s2243_s12 = smov (%p1185_p5, %s1184_s12), 0  ;;  %1156 = sbr.rel (!%p1153_p6) target bundleno = 915 (0x393), region = 220 }
 0x397   : >> { %1173 = vst [vmem:[%s1840_s24 + $0x30] sm:$0xff] %v1172_v3  ;;  %1175 = vst [vmem:[%s1840_s24 + $0x38] sm:$0xff] %v1174_v4  ;;  %v1178_v6 = vld [vmem:[%s1844_s8 + $0x48] sm:$0xff]  ;;  %v1180_v7 = vld [vmem:[%s1844_s8 + $0x50] sm:$0xff]  ;;  %s1187_s13 = smul.u32 96, %s2243_s12  ;;  %s2230_s7 = smov %s2243_s12 }
 0x398   : >> { %1177 = vst [vmem:[%s1840_s24 + $0x40] sm:$0xff] %v1176_v5  ;;  %v1182_v8 = vld [vmem:[%s1844_s8 + $0x58] sm:$0xff]  ;;  %1179 = vst [vmem:[%s1840_s24 + $0x48] sm:$0xff] %v1178_v6 }
 0x399   : >> { %1181 = vst [vmem:[%s1840_s24 + $0x50] sm:$0xff] %v1180_v7  ;;  %1183 = vst [vmem:[%s1840_s24 + $0x58] sm:$0xff] %v1182_v8  ;;  %s1189_s8 = scalar_lea.vmem %s2077_s14, %s1187_s13 [#allocation3]   ;;  %s1190_s24 = scalar_lea.vmem %s2159_s27, %s1187_s13  }
 0x39d PF: > { %1716 = sdivrem.u32 %s2241_s21, 12 }
 0x39e   : > { %s1449_s15 = smul.u32 96, %s2165_s29 }
 0x3a0   : > { %s1195_s16 = scalar_lea.vmem %s2077_s14, %s1449_s15 [#allocation3]   ;;  %s1197_s17 = scalar_lea.vmem %s2159_s27, %s1449_s15  }
 0x3a6   : > { %s1717_s19 = spop.drf %1716 }
 0x3a7   : > { %p1451_p7 = scmp.le.s32.totalorder %s1717_s19, 0 }
 0x3a8   : > { %s1854_s9 = smov (!%p1451_p7), %s1197_s17   ;;  %s1858_s23 = smov (!%p1451_p7), %s1195_s16  }
 0x3a9   : > { %1355 = sbr.rel (%p1451_p7) target bundleno = 954 (0x3ba), region = 225  ;;  %s1862_s10 = smov (!%p1451_p7), 0  }
 0x3aa   : > { %s1866_s18 = smov (!%p1451_p7), 0  }
 0x3b0 LB: >> { %v1207_v9 = vld [vmem:[%s1860_s23] sm:$0xff]  ;;  %s1209_s20 = sadd.s32 1, %s1864_s10  ;;  %s1201_s18 = sadd.s32 1, %s1868_s18   ;;  %s1868_s18 = sphi %s1866_s18, %s1201_s18   ;;  %s1864_s10 = sphi %s1862_s10, %s1863_s10   ;;  %s1860_s23 = sphi %s1858_s23, %s1214_s23   ;;  %s1856_s9 = sphi %s1854_s9, %s1215_s9  }
 0x3b1   : >> { %1208 = vst [vmem:[%s1856_s9] sm:$0xff] %v1207_v9  ;;  %p1210_p8 = scmp.ge.s32.totalorder %s1209_s20, %s1717_s19  ;;  %p1200_p9 = scmp.ge.s32.totalorder %s1201_s18, %s1717_s19 }
 0x3b3   : >> { %s2245_s20 = smov (%p1210_p8, %s1209_s20), 0  ;;  %1203 = sbr.rel (!%p1200_p9) target bundleno = 944 (0x3b0), region = 231 }
 0x3b4   : >> { %s1452_s14 = sshll.u32 %s2245_s20, 3  ;;  %s1863_s10 = smov %s2245_s20  }
 0x3b5   : >> { %s1214_s23 = scalar_lea.vmem %s1195_s16, %s1452_s14 [#allocation3]   ;;  %s1215_s9 = scalar_lea.vmem %s1197_s17, %s1452_s14  }
 0x3ba PF: > { %p14_p10 = scmp.ge.s32.totalorder %s1922_s25, 5   ;;  %s2231_s21 = smov %s1800_s22 }
 0x3bb   : > { %s2232_s22 = smov %s1930_s28  ;;  %s2233_s23 = smov %s1922_s25 }
 0x3bc   :  { %16 = sbr.rel (!%p14_p10) target bundleno = 2 (0x2), region = 242 }

</bundles_post_ra>
